<compile_context>
chip_gen: v7x
topology: tpu7x:2x2x1
jax: 0.10.0
libtpu: 0.0.40
codegen_flags: <defaults>
</compile_context>

<pallas_src>
import functools

import jax
import jax.numpy as jnp
from jax.experimental import pallas as pl
from jax.experimental.pallas import tpu as pltpu

_LANE = 128
_SUBLANE = 8
_MAX_BATCH_TILE = 1024


def _round_up(x: int, m: int) -> int:
    return ((x + m - 1) // m) * m


def _pick_batch_tile(batch: int) -> int:
    """Batch-tile rows: multiple of 8, <= 1024, >= 2 grid steps when possible."""
    if batch <= _SUBLANE:
        return _SUBLANE
    # ceil(B/2) rounded up to a sublane multiple -> grid length >= 2 for any
    # batch > 8, keeping both v7x TCs busy; the 1024 cap keeps double-buffered
    # f32 activation tiles ~6 MiB for c_in = 784.
    return min(_MAX_BATCH_TILE, _round_up(pl.cdiv(batch, 2), _SUBLANE))


def _simple_layer_kernel(x_ref, w_ref, b_ref, o_ref):
    # x_ref: (TB, c_in), w_ref: (c_in, c_pad), b_ref: (1, c_pad), o_ref: (TB, c_pad)
    y = jnp.dot(x_ref[...], w_ref[...], preferred_element_type=jnp.float32)
    y = y + b_ref[...]                                     # bias, broadcast over rows
    o_ref[...] = jnp.maximum(y, 0.0).astype(o_ref.dtype)   # act_fn = ReLU


def pack_params(weight, bias, dtype=jnp.float32):
    """One-time parameter packing (call at init, NOT per forward).

    weight: (c_out, c_in) PyTorch nn.Linear layout; bias: (c_out,).
    Returns w_packed (c_in, c_pad) in `dtype` and b_packed (1, c_pad) f32,
    zero-padded so the kernel output is 128-lane dense.  Pass
    dtype=jnp.bfloat16 to halve weight/activation HBM reads (numerics change).
    """
    c_out, c_in = weight.shape
    c_pad = _round_up(c_out, _LANE)
    w_packed = jnp.zeros((c_in, c_pad), dtype).at[:, :c_out].set(weight.T.astype(dtype))
    b_packed = jnp.zeros((1, c_pad), jnp.float32).at[:, :c_out].set(
        bias.astype(jnp.float32))
    return w_packed, b_packed


@functools.partial(jax.jit, static_argnames=("c_out",))
def simple_layer_forward(x_nchw, w_packed, b_packed, *, c_out):
    """x_nchw: (B, C, H, W) with C*H*W == c_in; returns (B, c_out) f32."""
    batch = x_nchw.shape[0]
    c_in, c_pad = w_packed.shape
    x_flat = x_nchw.reshape(batch, c_in).astype(w_packed.dtype)   # nn.Flatten()

    tb = _pick_batch_tile(batch)
    # Ragged final tile handled by Pallas: no wrapper-side pad copy of x.
    grid = (pl.cdiv(batch, tb),)

    cost = pl.CostEstimate(
        flops=2 * batch * c_in * c_pad,
        transcendentals=0,
        bytes_accessed=(x_flat.dtype.itemsize * batch * c_in
                        + w_packed.dtype.itemsize * c_in * c_pad
                        + 4 * c_pad
                        + 4 * batch * c_pad),
    )

    out_padded = pl.pallas_call(
        _simple_layer_kernel,
        out_shape=jax.ShapeDtypeStruct((batch, c_pad), jnp.float32),
        grid_spec=pltpu.PrefetchScalarGridSpec(
            num_scalar_prefetch=0,
            grid=grid,
            in_specs=[
                pl.BlockSpec((tb, c_in), lambda i: (i, 0)),      # activations: batch-tiled
                pl.BlockSpec((c_in, c_pad), lambda i: (0, 0)),   # weight: VMEM-resident
                pl.BlockSpec((1, c_pad), lambda i: (0, 0)),      # bias:   VMEM-resident
            ],
            out_specs=pl.BlockSpec((tb, c_pad), lambda i: (i, 0)),
        ),
        compiler_params=pltpu.CompilerParams(
            dimension_semantics=("parallel",),   # batch steps split across v7x's 2 TCs
        ),
        cost_estimate=cost,
    )(x_flat, w_packed, b_packed)

    # Rows are already exactly `batch`; just drop the 128-lane output padding.
    return out_padded[:, :c_out]


if __name__ == "__main__":
    # Module config: SimpleLayer('relu', c_in=28*28, c_out=10)
    c_in, c_out = 28 * 28, 10

    key = jax.random.PRNGKey(0)
    k_x, k_w, k_b = jax.random.split(key, 3)

    # nn.Linear default init: U(-1/sqrt(c_in), 1/sqrt(c_in))
    bound = 1.0 / jnp.sqrt(jnp.float32(c_in))
    weight = jax.random.uniform(k_w, (c_out, c_in), jnp.float32, -bound, bound)
    bias = jax.random.uniform(k_b, (c_out,), jnp.float32, -bound, bound)

    # One-time packing (init time, not the per-step hot path). f32 keeps the
    # check vs. the reference exact; use dtype=jnp.bfloat16 in production.
    w_packed, b_packed = jax.block_until_ready(pack_params(weight, bias))

    # B=8: single full tile (grid=1).  B=13: two grid steps with a ragged
    # final tile, exercising the no-pad / masked-output-write path.
    for batch in (8, 13):
        x = jax.random.normal(jax.random.fold_in(k_x, batch),
                              (batch, 1, 28, 28), jnp.float32)
        out = jax.block_until_ready(
            simple_layer_forward(x, w_packed, b_packed, c_out=c_out))

        # Reference in plain JAX (same math as the PyTorch forward).
        ref = jnp.maximum(x.reshape(batch, c_in) @ weight.T + bias, 0.0)
        assert out.shape == (batch, c_out)
        assert jnp.allclose(out, ref, atol=1e-5, rtol=1e-5), f"mismatch at batch={batch}"

    print("KERNEL_OK")
</pallas_src>

<mosaic_0001>
module attributes {stable_mosaic.version = 11 : i64} {
  func.func @_simple_layer_kernel(%arg0: i32, %arg1: memref<8x784xf32, #tpu.memory_space<vmem>>, %arg2: memref<784x128xf32, #tpu.memory_space<vmem>>, %arg3: memref<1x128xf32, #tpu.memory_space<vmem>>, %arg4: memref<8x128xf32, #tpu.memory_space<vmem>>) attributes {dimension_semantics = [#tpu.dimension_semantics<parallel>], iteration_bounds = array<i64: 1>, scalar_prefetch = 0 : i64, scratch_operands = 0 : i64, tpu.core_type = #tpu.core_type<tc>, window_params = [{transform_indices = @transform_0, window_bounds = array<i64: 8, 784>}, {pipeline_mode = #tpu.pipeline_mode<synchronous>, transform_indices = @transform_1, window_bounds = array<i64: 784, 128>}, {pipeline_mode = #tpu.pipeline_mode<synchronous>, transform_indices = @transform_2, window_bounds = array<i64: 1, 128>}, {transform_indices = @transform_3, window_bounds = array<i64: 8, 128>}]} {
    %c0 = arith.constant 0 : index
    %c0_0 = arith.constant 0 : index
    %0 = vector.load %arg1[%c0, %c0_0] : memref<8x784xf32, #tpu.memory_space<vmem>>, vector<8x784xf32>
    %c0_1 = arith.constant 0 : index
    %c0_2 = arith.constant 0 : index
    %1 = vector.load %arg2[%c0_1, %c0_2] : memref<784x128xf32, #tpu.memory_space<vmem>>, vector<784x128xf32>
    %cst = arith.constant dense<0.000000e+00> : vector<8x128xf32>
    %2 = tpu.matmul %0, %1, %cst {dimension_numbers = #tpu.dot_dimension_numbers<[1], [0], [0], [1], [0, 0, 1, 1], [], []>} : vector<8x784xf32>, vector<784x128xf32>, vector<8x128xf32> -> vector<8x128xf32>
    %c0_3 = arith.constant 0 : index
    %c0_4 = arith.constant 0 : index
    %3 = vector.load %arg3[%c0_3, %c0_4] : memref<1x128xf32, #tpu.memory_space<vmem>>, vector<1x128xf32>
    %4 = vector.broadcast %3 : vector<1x128xf32> to vector<8x128xf32>
    %5 = arith.addf %2, %4 : vector<8x128xf32>
    %cst_5 = arith.constant 0.000000e+00 : f32
    %6 = vector.broadcast %cst_5 : f32 to vector<8x128xf32>
    %7 = arith.maximumf %5, %6 : vector<8x128xf32>
    %c0_6 = arith.constant 0 : index
    %c0_7 = arith.constant 0 : index
    %8 = vector.load %arg4[%c0_6, %c0_7] : memref<8x128xf32, #tpu.memory_space<vmem>>, vector<8x128xf32>
    tpu.vector_store %arg4[%c0_6, %c0_7], %7 {strides = array<i32>} : memref<8x128xf32, #tpu.memory_space<vmem>>, vector<8x128xf32>,
    return
  }
  func.func @transform_0(%arg0: i32) -> (i32, i32) {
    %c0_i32 = arith.constant 0 : i32
    %c0_i32_0 = arith.constant 0 : i32
    return %arg0, %c0_i32 : i32, i32
  }
  func.func @transform_1(%arg0: i32) -> (i32, i32) {
    %c0_i32 = arith.constant 0 : i32
    %c0_i32_0 = arith.constant 0 : i32
    %c0_i32_1 = arith.constant 0 : i32
    return %c0_i32, %c0_i32_0 : i32, i32
  }
  func.func @transform_2(%arg0: i32) -> (i32, i32) {
    %c0_i32 = arith.constant 0 : i32
    %c0_i32_0 = arith.constant 0 : i32
    %c0_i32_1 = arith.constant 0 : i32
    return %c0_i32, %c0_i32_0 : i32, i32
  }
  func.func @transform_3(%arg0: i32) -> (i32, i32) {
    %c0_i32 = arith.constant 0 : i32
    %c0_i32_0 = arith.constant 0 : i32
    return %arg0, %c0_i32 : i32, i32
  }
}

</mosaic_0001>

<bundles_post_ra>
// kernel: simple_layer_forward.1
= control target key start
LH: loop header
LB: loop body
LE: loop exit
PB: predicated region body
PF: predicated region fallthrough
CT: control target
= control target key end

     0   :  { %s1025_s0 = inlined_call_operand.vmem [shape: f32[8,784], index: 0, kind: input, shape index: {}]   ;;  %s1026_s1 = inlined_call_operand.vmem [shape: f32[784,128], index: 1, kind: input, shape index: {}]   ;;  %s1027_s2 = inlined_call_operand.vmem [shape: f32[1,128], index: 2, kind: input, shape index: {}]   ;;  %s1028_s3 = inlined_call_operand.hbm [shape: f32[8,128], index: 3, kind: output, shape index: {}]  }
   0x1   :  { %v38_v0 = vld [vmem:[%s1026_s1 + $0x80] sm:$0xff]  ;;  %v39_v1 = vld [vmem:[%s1026_s1 + $0x88] sm:$0xff]  ;;  %v40_v11 = vld [vmem:[%s1026_s1 + $0x90] sm:$0xff] }
   0x2   :  { %v22_v2 = vld [vmem:[%s1026_s1] sm:$0xff]  ;;  %v544_v3 = vpack.c.bf16 %v39_v1, %v38_v0  ;;  %v23_v4 = vld [vmem:[%s1026_s1 + $0x8] sm:$0xff]  ;;  %v41_v13 = vld [vmem:[%s1026_s1 + $0x98] sm:$0xff] }
   0x3   :  { %v70_v5 = vld [vmem:[%s1026_s1 + $0x180] sm:$0xff]  ;;  %v71_v6 = vld [vmem:[%s1026_s1 + $0x188] sm:$0xff]  ;;  %v546_v7 = vpack.c.bf16 %v23_v4, %v22_v2  ;;  %v24_v14 = vld [vmem:[%s1026_s1 + $0x10] sm:$0xff]  ;;  %v548_v16 = vpack.c.bf16 %v41_v13, %v40_v11 }
   0x4   :  { %v576_v8 = vpack.c.bf16 %v71_v6, %v70_v5  ;;  %v54_v9 = vld [vmem:[%s1026_s1 + $0x100] sm:$0xff]  ;;  %v55_v10 = vld [vmem:[%s1026_s1 + $0x108] sm:$0xff]  ;;  %545 = vmatprep.subr.bf16.mxu0 %v544_v3  ;;  %v25_v15 = vld [vmem:[%s1026_s1 + $0x18] sm:$0xff] }
   0x5   :  { %v578_v12 = vpack.c.bf16 %v55_v10, %v54_v9  ;;  %547 = vmatpush3.bf16.msra.mxu0 %v546_v7  ;;  %v550_v17 = vpack.c.bf16 %v25_v15, %v24_v14  ;;  %v72_v18 = vld [vmem:[%s1026_s1 + $0x190] sm:$0xff]  ;;  %v73_v19 = vld [vmem:[%s1026_s1 + $0x198] sm:$0xff]  ;;  %v42_v23 = vld [vmem:[%s1026_s1 + $0xa0] sm:$0xff] }
   0x6   :  { %577 = vmatprep.subr.bf16.mxu1 %v576_v8  ;;  %v56_v20 = vld [vmem:[%s1026_s1 + $0x110] sm:$0xff]  ;;  %v580_v21 = vpack.c.bf16 %v73_v19, %v72_v18  ;;  %v57_v22 = vld [vmem:[%s1026_s1 + $0x118] sm:$0xff]  ;;  %v43_v24 = vld [vmem:[%s1026_s1 + $0xa8] sm:$0xff]  ;;  %549 = vmatprep.subr.bf16.mxu0 %v548_v16 }
   0x7   :  { %579 = vmatpush3.bf16.msra.mxu1 %v578_v12  ;;  %v582_v25 = vpack.c.bf16 %v57_v22, %v56_v20  ;;  %v552_v26 = vpack.c.bf16 %v43_v24, %v42_v23  ;;  %v26_v27 = vld [vmem:[%s1026_s1 + $0x20] sm:$0xff]  ;;  %v27_v28 = vld [vmem:[%s1026_s1 + $0x28] sm:$0xff]  ;;  %v44_v35 = vld [vmem:[%s1026_s1 + $0xb0] sm:$0xff] }
   0x8   :  { %v74_v29 = vld [vmem:[%s1026_s1 + $0x1a0] sm:$0xff]  ;;  %581 = vmatprep.subr.bf16.mxu1 %v580_v21  ;;  %v75_v30 = vld [vmem:[%s1026_s1 + $0x1a8] sm:$0xff]  ;;  %v554_v33 = vpack.c.bf16 %v27_v28, %v26_v27  ;;  %v45_v36 = vld [vmem:[%s1026_s1 + $0xb8] sm:$0xff] }
   0x9   :  { %v58_v31 = vld [vmem:[%s1026_s1 + $0x120] sm:$0xff]  ;;  %v59_v32 = vld [vmem:[%s1026_s1 + $0x128] sm:$0xff]  ;;  %551 = vmatpush3.bf16.msra.mxu0 %v550_v17  ;;  %v584_v34 = vpack.c.bf16 %v75_v30, %v74_v29  ;;  %v28_v37 = vld [vmem:[%s1026_s1 + $0x30] sm:$0xff]  ;;  %v556_v39 = vpack.c.bf16 %v45_v36, %v44_v35 }
   0xa   :  { %553 = vmatprep.subr.bf16.mxu0 %v552_v26  ;;  %v586_v38 = vpack.c.bf16 %v59_v32, %v58_v31  ;;  %v29_v40 = vld [vmem:[%s1026_s1 + $0x38] sm:$0xff]  ;;  %v76_v41 = vld [vmem:[%s1026_s1 + $0x1b0] sm:$0xff]  ;;  %v46_v46 = vld [vmem:[%s1026_s1 + $0xc0] sm:$0xff] }
   0xb   :  { %583 = vmatpush3.bf16.msra.mxu1 %v582_v25  ;;  %v77_v42 = vld [vmem:[%s1026_s1 + $0x1b8] sm:$0xff]  ;;  %v60_v44 = vld [vmem:[%s1026_s1 + $0x130] sm:$0xff]  ;;  %v47_v47 = vld [vmem:[%s1026_s1 + $0xc8] sm:$0xff]  ;;  %v558_v48 = vpack.c.bf16 %v29_v40, %v28_v37 }
   0xc   :  { %585 = vmatprep.subr.bf16.mxu1 %v584_v34  ;;  %v588_v43 = vpack.c.bf16 %v77_v42, %v76_v41  ;;  %v61_v45 = vld [vmem:[%s1026_s1 + $0x138] sm:$0xff]  ;;  %v78_v49 = vld [vmem:[%s1026_s1 + $0x1c0] sm:$0xff]  ;;  %v79_v50 = vld [vmem:[%s1026_s1 + $0x1c8] sm:$0xff]  ;;  %v560_v52 = vpack.c.bf16 %v47_v47, %v46_v46 }
   0xd   :  { %555 = vmatpush3.bf16.msra.mxu0 %v554_v33  ;;  %v590_v51 = vpack.c.bf16 %v61_v45, %v60_v44  ;;  %v30_v53 = vld [vmem:[%s1026_s1 + $0x40] sm:$0xff]  ;;  %v31_v54 = vld [vmem:[%s1026_s1 + $0x48] sm:$0xff]  ;;  %v592_v56 = vpack.c.bf16 %v79_v50, %v78_v49  ;;  %v48_v58 = vld [vmem:[%s1026_s1 + $0xd0] sm:$0xff]  ;;  %v671_v50 = vmov 0.0|0.0  }
   0xe   :  { %557 = vmatprep.subr.bf16.mxu0 %v556_v39  ;;  %v62_v55 = vld [vmem:[%s1026_s1 + $0x140] sm:$0xff]  ;;  %v63_v57 = vld [vmem:[%s1026_s1 + $0x148] sm:$0xff]  ;;  %v49_v59 = vld [vmem:[%s1026_s1 + $0xd8] sm:$0xff]  ;;  %v562_v62 = vpack.c.bf16 %v31_v54, %v30_v53 }
   0xf   :  { %587 = vmatpush3.bf16.msra.mxu1 %v586_v38  ;;  %v80_v60 = vld [vmem:[%s1026_s1 + $0x1d0] sm:$0xff]  ;;  %v81_v61 = vld [vmem:[%s1026_s1 + $0x1d8] sm:$0xff]  ;;  %v594_v63 = vpack.c.bf16 %v63_v57, %v62_v55  ;;  %v564_v0 = vpack.c.bf16 %v49_v59, %v48_v58  ;;  %v50_v6 = vld [vmem:[%s1026_s1 + $0xe0] sm:$0xff] }
  0x10   :  { %589 = vmatprep.subr.bf16.mxu1 %v588_v43  ;;  %v32_v1 = vld [vmem:[%s1026_s1 + $0x50] sm:$0xff]  ;;  %v33_v2 = vld [vmem:[%s1026_s1 + $0x58] sm:$0xff]  ;;  %v596_v4 = vpack.c.bf16 %v81_v61, %v80_v60  ;;  %v51_v7 = vld [vmem:[%s1026_s1 + $0xe8] sm:$0xff] }
  0x11   :  { %559 = vmatpush3.bf16.msra.mxu0 %v558_v48  ;;  %v64_v3 = vld [vmem:[%s1026_s1 + $0x150] sm:$0xff]  ;;  %v65_v5 = vld [vmem:[%s1026_s1 + $0x158] sm:$0xff]  ;;  %v82_v8 = vld [vmem:[%s1026_s1 + $0x1e0] sm:$0xff]  ;;  %v566_v10 = vpack.c.bf16 %v33_v2, %v32_v1  ;;  %v568_v14 = vpack.c.bf16 %v51_v7, %v50_v6 }
  0x12   :  { %561 = vmatprep.subr.bf16.mxu0 %v560_v52  ;;  %v83_v9 = vld [vmem:[%s1026_s1 + $0x1e8] sm:$0xff]  ;;  %v34_v11 = vld [vmem:[%s1026_s1 + $0x60] sm:$0xff]  ;;  %v598_v13 = vpack.c.bf16 %v65_v5, %v64_v3  ;;  %v52_v19 = vld [vmem:[%s1026_s1 + $0xf0] sm:$0xff] }
  0x13   :  { %591 = vmatpush3.bf16.msra.mxu1 %v590_v51  ;;  %v16_v12 = vld [vmem:[%s1025_s0 + $0x8] sm:$0xff]  ;;  %v66_v16 = vld [vmem:[%s1026_s1 + $0x160] sm:$0xff]  ;;  %v600_v18 = vpack.c.bf16 %v83_v9, %v82_v8  ;;  %v53_v20 = vld [vmem:[%s1026_s1 + $0xf8] sm:$0xff] }
  0x14   :  { %593 = vmatprep.subr.bf16.mxu1 %v592_v56  ;;  %v35_v15 = vld [vmem:[%s1026_s1 + $0x68] sm:$0xff]  ;;  %195 = vmatprep.mubr.f32.mxu0 %v16_v12  ;;  %v18_v21 = vld [vmem:[%s1025_s0 + $0x18] sm:$0xff]  ;;  %v84_v22 = vld [vmem:[%s1026_s1 + $0x1f0] sm:$0xff]  ;;  %v572_v26 = vpack.c.bf16 %v53_v20, %v52_v19 }
  0x15   :  { %563 = vmatpush3.bf16.msra.mxu0 %v562_v62  ;;  %v67_v17 = vld [vmem:[%s1026_s1 + $0x168] sm:$0xff]  ;;  %v85_v23 = vld [vmem:[%s1026_s1 + $0x1f8] sm:$0xff]  ;;  %265 = vmatprep.mubr.f32.mxu1 %v18_v21  ;;  %v570_v24 = vpack.c.bf16 %v35_v15, %v34_v11  ;;  %v36_v27 = vld [vmem:[%s1026_s1 + $0x70] sm:$0xff] }
  0x16   :  { %565 = vmatprep.subr.bf16.mxu0 %v564_v0  ;;  %v602_v25 = vpack.c.bf16 %v67_v17, %v66_v16  ;;  %v37_v28 = vld [vmem:[%s1026_s1 + $0x78] sm:$0xff]  ;;  %v68_v29 = vld [vmem:[%s1026_s1 + $0x170] sm:$0xff]  ;;  %v604_v30 = vpack.c.bf16 %v85_v23, %v84_v22  ;;  %v102_v32 = vld [vmem:[%s1026_s1 + $0x280] sm:$0xff] }
  0x17   :  { %595 = vmatpush3.bf16.msra.mxu1 %v594_v63  ;;  %v69_v31 = vld [vmem:[%s1026_s1 + $0x178] sm:$0xff]  ;;  %v103_v33 = vld [vmem:[%s1026_s1 + $0x288] sm:$0xff]  ;;  %v574_v34 = vpack.c.bf16 %v37_v28, %v36_v27  ;;  %v86_v37 = vld [vmem:[%s1026_s1 + $0x200] sm:$0xff] }
  0x18   :  { %597 = vmatprep.subr.bf16.mxu1 %v596_v4  ;;  %v606_v35 = vpack.c.bf16 %v69_v31, %v68_v29  ;;  %v608_v36 = vpack.c.bf16 %v103_v33, %v102_v32  ;;  %v87_v38 = vld [vmem:[%s1026_s1 + $0x208] sm:$0xff]  ;;  %v104_v39 = vld [vmem:[%s1026_s1 + $0x290] sm:$0xff]  ;;  %v105_v40 = vld [vmem:[%s1026_s1 + $0x298] sm:$0xff] }
  0x19   :  { %567 = vmatpush3.bf16.msra.mxu0 %v566_v10  ;;  %v15_v41 = vld [vmem:[%s1025_s0] sm:$0xff]  ;;  %v610_v42 = vpack.c.bf16 %v87_v38, %v86_v37  ;;  %v17_v43 = vld [vmem:[%s1025_s0 + $0x10] sm:$0xff]  ;;  %v612_v45 = vpack.c.bf16 %v105_v40, %v104_v39  ;;  %v89_v46 = vld [vmem:[%s1026_s1 + $0x218] sm:$0xff] }
  0x1a   :  { %569 = vmatprep.subr.bf16.mxu0 %v568_v14  ;;  %v88_v44 = vld [vmem:[%s1026_s1 + $0x210] sm:$0xff]  ;;  %v106_v47 = vld [vmem:[%s1026_s1 + $0x2a0] sm:$0xff]  ;;  %v107_v48 = vld [vmem:[%s1026_s1 + $0x2a8] sm:$0xff] }
  0x1b   :  { %599 = vmatpush3.bf16.msra.mxu1 %v598_v13  ;;  %v20_v49 = vld [vmem:[%s1025_s0 + $0x28] sm:$0xff]  ;;  %v118_v51 = vld [vmem:[%s1026_s1 + $0x300] sm:$0xff] }
  0x1c   :  { %601 = vmatprep.subr.bf16.mxu1 %v600_v18  ;;  %v119_v52 = vld [vmem:[%s1026_s1 + $0x308] sm:$0xff] }
  0x1d   :  { %571 = vmatpush3.bf16.msra.mxu0 %v570_v24  ;;  %v641_v53 = vpack.c.bf16 %v119_v52, %v118_v51 }
  0x1e   :  { %573 = vmatprep.subr.bf16.mxu0 %v572_v26 }
  0x1f   :  { %603 = vmatpush3.bf16.msra.mxu1 %v602_v25 }
  0x20   :  { %605 = vmatprep.subr.bf16.mxu1 %v604_v30 }
  0x21   :  { %575 = vmatpush3.bf16.msra.mxu0 %v574_v34 }
  0x22   :  { %609 = vmatprep.subr.bf16.mxu0 %v608_v36 }
  0x23   :  { %607 = vmatpush3.bf16.msra.mxu1 %v606_v35 }
  0x24   :  { %640 = vmatprep.subr.bf16.mxu1 %v671_v50  ;;  %196 = vmatmul.mubr.f32.vlgmr.msra.gmra.mrb[0].mxu0 %v15_v41 }
  0x25   :  { %8 = vsyncpa [#allocation3], 0  ;;  %611 = vmatpush3.bf16.msra.mxu0 %v610_v42  ;;  %v614_v54 = vpack.c.bf16 %v89_v46, %v88_v44  ;;  %v616_v55 = vpack.c.bf16 %v107_v48, %v106_v47  ;;  %v90_v56 = vld [vmem:[%s1026_s1 + $0x220] sm:$0xff]  ;;  %v91_v57 = vld [vmem:[%s1026_s1 + $0x228] sm:$0xff]  ;;  %335 = vmatprep.mubr.f32.mxu0 %v20_v49  ;;  %vm672_vm0 = vmmov 0   ;;  %v673_v60 = vmov 0.0  }
  0x26   :  { %266 = vmatmul.mubr.f32.vlgmr.msra.gmra.mrb[0].mxu1 %v17_v43  ;;  %613 = vmatprep.subr.bf16.mxu0 %v612_v45  ;;  %v108_v58 = vld [vmem:[%s1026_s1 + $0x2b0] sm:$0xff]  ;;  %v109_v59 = vld [vmem:[%s1026_s1 + $0x2b8] sm:$0xff]  ;;  %vm127_vm1 = vcmask 130048   ;;  %v618_v62 = vpack.c.bf16 %v91_v57, %v90_v56  ;;  %v110_v2 = vld [vmem:[%s1026_s1 + $0x2c0] sm:$0xff] }
  0x27   :  { %642 = vmatpush3.bf16.msra.mxu1 %v641_v53  ;;  %541 = vmatprep.mubr.msk.f32.mxu1 %vm672_vm0, %v673_v60  ;;  %v21_v61 = vld [vmem:[%s1025_s0 + $0x30] sm:$0xff]  ;;  %v620_v63 = vpack.c.bf16 %v109_v59, %v108_v58  ;;  %v93_v1 = vld [vmem:[%s1026_s1 + $0x238] sm:$0xff]  ;;  %v111_v3 = vld [vmem:[%s1026_s1 + $0x2c8] sm:$0xff] }
  0x28   :  { %v92_v0 = vld [vmem:[%s1026_s1 + $0x230] sm:$0xff]  ;;  %v624_v5 = vpack.c.bf16 %v111_v3, %v110_v2  ;;  %v94_v6 = vld [vmem:[%s1026_s1 + $0x240] sm:$0xff]  ;;  %v95_v7 = vld [vmem:[%s1026_s1 + $0x248] sm:$0xff] }
  0x29   :  { %615 = vmatpush3.bf16.msra.mxu0 %v614_v54  ;;  %v622_v4 = vpack.c.bf16 %v93_v1, %v92_v0  ;;  %v112_v8 = vld [vmem:[%s1026_s1 + $0x2d0] sm:$0xff]  ;;  %v113_v9 = vld [vmem:[%s1026_s1 + $0x2d8] sm:$0xff]  ;;  %v626_v10 = vpack.c.bf16 %v95_v7, %v94_v6  ;;  %v114_v14 = vld [vmem:[%s1026_s1 + $0x2e0] sm:$0xff] }
  0x2a   :  { %617 = vmatprep.subr.bf16.mxu0 %v616_v55  ;;  %542 = vmatmul.mubr.msk.f32.vlgmr.msra.gmra.mrb[2].mxu1 %vm127_vm1, %v21_v61  ;;  %v628_v11 = vpack.c.bf16 %v113_v9, %v112_v8  ;;  %v96_v12 = vld [vmem:[%s1026_s1 + $0x250] sm:$0xff]  ;;  %v97_v13 = vld [vmem:[%s1026_s1 + $0x258] sm:$0xff]  ;;  %v115_v15 = vld [vmem:[%s1026_s1 + $0x2e8] sm:$0xff] }
  0x2b   :  { %v630_v16 = vpack.c.bf16 %v97_v13, %v96_v12  ;;  %v632_v17 = vpack.c.bf16 %v115_v15, %v114_v14  ;;  %v98_v18 = vld [vmem:[%s1026_s1 + $0x260] sm:$0xff]  ;;  %v99_v19 = vld [vmem:[%s1026_s1 + $0x268] sm:$0xff]  ;;  %v116_v20 = vld [vmem:[%s1026_s1 + $0x2f0] sm:$0xff] }
  0x2c   :  { %v117_v21 = vld [vmem:[%s1026_s1 + $0x2f8] sm:$0xff]  ;;  %v634_v22 = vpack.c.bf16 %v99_v19, %v98_v18  ;;  %v100_v24 = vld [vmem:[%s1026_s1 + $0x270] sm:$0xff]  ;;  %v19_v27 = vld [vmem:[%s1025_s0 + $0x20] sm:$0xff]  ;;  %s674_s0 = smov [#allocation2]  }
  0x2d   :  { %619 = vmatpush3.bf16.msra.mxu0 %v618_v62  ;;  %v636_v23 = vpack.c.bf16 %v117_v21, %v116_v20  ;;  %v101_v25 = vld [vmem:[%s1026_s1 + $0x278] sm:$0xff]  ;;  %v427_v29 = vld [vmem:[%s1027_s2] ss:$0 sm:$0xff]  ;;  %s419_s1 = sshll.u32 %s674_s0, 4  ;;  %s420_s1 = int_to_ptr.vmem [resolvable:$true] %s419_s1 }
  0x2e   :  { %621 = vmatprep.subr.bf16.mxu0 %v620_v63  ;;  %v638_v26 = vpack.c.bf16 %v101_v25, %v100_v24  ;;  %s647_s2 = scalar_lea.vmem %s420_s1, 128  ;;  %p652_p1 = scmp.lt.s32.totalorder %s420_s1, %s420_s1 }
  0x2f   :  { %p648_p0 = scmp.ne.s32.totalorder %s420_s1, %s647_s2  ;;  %p653_p2 = scmp.lt.s32.totalorder %s647_s2, %s647_s2 }
  0x31   :  { %623 = vmatpush3.bf16.msra.mxu0 %v622_v4  ;;  %p654_p3 = por %p653_p2, %p652_p1 }
  0x32   :  { %625 = vmatprep.subr.bf16.mxu0 %v624_v5 }
  0x33   :  { %p655_p4 = pnand %p654_p3, %p648_p0 }
  0x35   :  { %627 = vmatpush3.bf16.msra.mxu0 %v626_v10 }
  0x36   :  { %629 = vmatprep.subr.bf16.mxu0 %v628_v11 }
  0x39   :  { %631 = vmatpush3.bf16.msra.mxu0 %v630_v16 }
  0x3a   :  { %633 = vmatprep.subr.bf16.mxu0 %v632_v17 }
  0x3d   :  { %635 = vmatpush3.bf16.msra.mxu0 %v634_v22 }
  0x3e   :  { %637 = vmatprep.subr.bf16.mxu0 %v636_v23 }
  0x41   :  { %639 = vmatpush3.bf16.msra.mxu0 %v638_v26 }
  0x44   :  { %336 = vmatmul.mubr.f32.vlgmr.msra.gmra.mrb[2].mxu0 %v19_v27 }
  0xf7   :  { %v461_v28 = vpop.f32.mrb[0].mxu0 }
  0xf8   :  { %v462_v30 = vpop.f32.mrb[1].mxu0 }
  0xf9   :  { %v496_v31 = vpop.f32.mrb[0].mxu1  ;;  %v463_v32 = vadd.f32 %v462_v30, %v461_v28 }
  0xfa   :  { %v497_v33 = vpop.f32.mrb[1].mxu1 }
  0xfb   :  { %v498_v34 = vadd.f32 %v497_v33, %v496_v31  ;;  %v198_v35 = vadd.f32 %v463_v32, %v427_v29 }
  0xfd   :  { %v268_v36 = vadd.f32 %v498_v34, %v198_v35  ;;  %v407_v37 = vpop.f32.mrb[2].mxu1 }
  0xfe   :  { %v543_v38 = vpop.f32.mrb[3].mxu1 }
 0x117   :  { %v531_v39 = vpop.f32.mrb[2].mxu0 }
 0x118   :  { %v532_v40 = vpop.f32.mrb[3].mxu0 }
 0x119   :  { %v533_v41 = vadd.f32 %v532_v40, %v531_v39 }
 0x11b   :  { %v338_v42 = vadd.f32 %v533_v41, %v268_v36 }
 0x11d   :  { %v408_v43 = vadd.f32 %v407_v37, %v338_v42 }
 0x11f   :  { %v411_v44 = vmax.f32 %v408_v43, 0.0 }
 0x121   :  { %412 = vst [vmem:[#allocation2] sm:$0xff] %v411_v44 }
 0x122   :  { %658 = shalt.err (!%p655_p4)
}
 0x123   :  { %s659_s10 = scalar_lea.hbm %s1028_s3, 128 }
 0x124   :  { %p660_p5 = scmp.ne.s32.totalorder %s1028_s3, %s659_s10  ;;  %p663_p6 = scmp.lt.u32.totalorder %s659_s10, %s1028_s3 }
 0x126   :  { %p665_p7 = pnand %p663_p6, %p660_p5 }
 0x128   :  { %668 = shalt.err (!%p665_p7)
}
 0x129   :  { %422 = dma.vmem_to_hbm [thread:$0]  %s420_s1, 128, %s1028_s3, [#allocation3]  }
 0x12a   :  { %669 = dma.done.wait [#allocation3], 128  }
 0x12b   :  { %670 = vsyncadd [#allocation3], 4294967168 }
 0x12c   :  { %426 = vsyncpa [#allocation3], 1 }

</bundles_post_ra>
